<compile_context>
chip_gen: v5e
topology: v5e:2x2
jax: 0.10.0
libtpu: 0.0.40
codegen_flags: <defaults>
</compile_context>

<pallas_src>
import jax
import jax.numpy as jnp
from jax.experimental import pallas as pl
from jax.experimental.pallas import tpu as pltpu


# ----------------------------------------------------------------------------
# Kernel factory (closes over static tiling config only; no arrays captured)
# ----------------------------------------------------------------------------
def _make_loss_kernel(TR, C, T):
    n_sub = TR // 8  # 8-row sub-chunks folded into the (8, C) vector accumulators

    def fold_sum(a):  # (TR, C) -> (8, C), tile-aligned static slices only
        out = a[0:8, :]
        for j in range(1, n_sub):
            out = out + a[8 * j:8 * (j + 1), :]
        return out

    def fold_max(a):
        out = a[0:8, :]
        for j in range(1, n_sub):
            out = jnp.maximum(out, a[8 * j:8 * (j + 1), :])
        return out

    def kernel(scal_ref, x_ref, y_ref, p_ref, out_ref,
               l1_acc, sm_acc, mx_acc, my_acc):
        i = pl.program_id(0)

        # ---- one pass over the block; everything derived from these loads ----
        x = x_ref[...]                      # (TR, C)
        y = y_ref[...]

        l1_p = fold_sum(jnp.abs(x - y))

        # lane-shifted copy with edge replication: shifted[:, 0] = x[:, 0]
        # (lane-0 diff is exactly 0; fold/junction/pad adjacency terms are
        #  tiny and handled on the host side via the smooth_extra scalar).
        x_shift = jnp.concatenate([x[:, 0:1], x[:, 0:C - 1]], axis=1)
        sm_p = fold_sum(jnp.abs(x - x_shift))

        mx_p = fold_max(x)
        my_p = fold_max(y)

        # ---- vector accumulators: assign on step 0 (no constant init needed) ----
        @pl.when(i == 0)
        def _init():
            l1_acc[...] = l1_p
            sm_acc[...] = sm_p
            mx_acc[...] = mx_p
            my_acc[...] = my_p

        @pl.when(i > 0)
        def _accum():
            l1_acc[...] = l1_acc[...] + l1_p
            sm_acc[...] = sm_acc[...] + sm_p
            mx_acc[...] = jnp.maximum(mx_acc[...], mx_p)
            my_acc[...] = jnp.maximum(my_acc[...], my_p)

        # ---- single cross-lane reduction + scalar glue, once, on the last step ----
        @pl.when(i == T - 1)
        def _finalize():
            attention_max = scal_ref[0]
            lambda_l2_reg = scal_ref[1]
            alpha_smooth = scal_ref[2]
            parameters_penalty = scal_ref[3]
            smooth_extra = scal_ref[4]

            l1_sum = jnp.sum(l1_acc[...])
            sm_sum = jnp.sum(sm_acc[...]) + smooth_extra
            mx = jnp.max(mx_acc[...])
            my = jnp.max(my_acc[...])

            p = p_ref[...]                  # resident VMEM block, DMA'd once
            l2_sum = jnp.sum(p * p)

            out_ref[0] = (l1_sum
                          + lambda_l2_reg * l2_sum
                          + alpha_smooth * sm_sum
                          + attention_max * jnp.abs(mx - my)
                          + parameters_penalty)

    return kernel


# ----------------------------------------------------------------------------
# Helpers
# ----------------------------------------------------------------------------
def _round_up(a, m):
    return -(-a // m) * m


def prepare_params(model_params):
    """Flatten + zero-pad model parameters ONCE (hoisted out of the call path).

    Returns (params_2d, num_params); params_2d is (rows, 128) f32, zero padded
    (padding contributes 0 to the sum of squares)."""
    flat = jnp.concatenate([jnp.ravel(p).astype(jnp.float32)
                            for p in model_params])
    num_params = int(flat.shape[0])
    rows = _round_up(max(num_params, 1), 128) // 128
    rows_pad = _round_up(rows, 8)
    flat = jnp.pad(flat, (0, rows_pad * 128 - num_params))
    return flat.reshape(rows_pad, 128), num_params


def _vmem_budget_bytes():
    """Generation-aware scoped-VMEM budget (conservative if undetectable)."""
    try:
        info = pltpu.get_tpu_info()
        cap = int(getattr(info, "vmem_capacity_bytes", 64 * 1024 * 1024))
    except Exception:
        cap = 64 * 1024 * 1024          # v7x-safe default
    return min(100 * 1024 * 1024, (cap * 3) // 4)


# ----------------------------------------------------------------------------
# Wrapper: MyCustomLoss.forward
# ----------------------------------------------------------------------------
def my_custom_loss(inp, tgt, params_2d, num_params,
                   attention_max=1.0, lambda_l2_reg=0.01, alpha_smooth_reg=0.1,
                   lane_width=512, max_block_rows=None):
    inp = jnp.asarray(inp, jnp.float32)
    tgt = jnp.asarray(tgt, jnp.float32)
    params_2d = jnp.asarray(params_2d, jnp.float32)

    B, L = inp.shape
    C = lane_width                      # multiple of 128
    N = B * L

    # ---------------- VMEM-budgeted tile sizing ----------------
    vmem_limit = _vmem_budget_bytes()
    param_bytes = int(params_2d.size) * 4
    # x block + y block, double buffered, plus a few block-sized temporaries.
    block_budget = max(512 * 1024, (vmem_limit - param_bytes) // 16)
    tr_target = max(8, (block_budget // (C * 4)) // 8 * 8)
    tr_target = min(tr_target, 2048)    # bound unrolled fold length / temporaries
    if max_block_rows is not None:
        tr_target = max(8, min(tr_target, (max_block_rows // 8) * 8))

    R = _round_up(N, C) // C            # data rows of width C
    TR = max(8, (min(tr_target, _round_up(R, 8)) // 8) * 8)
    R_pad = _round_up(R, TR)
    T = R_pad // TR                     # grid steps

    # ---------------- sublane/lane-dense padded layout ----------------
    # Shared fill <= both maxima => pad region contributes 0 to L1 and never
    # changes max(x) / max(y).
    fill = jnp.minimum(inp[0, 0], tgt[0, 0]).astype(jnp.float32)
    pad = R_pad * C - N

    def to_2d(a):
        af = a.reshape(N)
        if pad:
            af = jnp.concatenate([af, jnp.full((pad,), fill, jnp.float32)])
        return af.reshape(R_pad, C)

    x2d = to_2d(inp)
    y2d = to_2d(tgt)

    # ---------------- tiny host-side smoothness adjacency terms ----------------
    # Kernel counts all lane-adjacent pairs (flattened position p with p % C != 0).
    # Add the fold-boundary pairs (p % C == 0), subtract the B-1 batch junction
    # pairs and the single data->pad boundary term. O(N / C) work total.
    xf = inp.reshape(N)
    n_bound = (N - 1) // C
    if n_bound > 0:
        idx = jnp.arange(1, n_bound + 1) * C
        across = jnp.sum(jnp.abs(xf[idx] - xf[idx - 1]))
    else:
        across = jnp.float32(0.0)
    if B > 1:
        junction = jnp.sum(jnp.abs(inp[1:, 0] - inp[:-1, L - 1]))
    else:
        junction = jnp.float32(0.0)
    if N % C != 0:
        spurious_end = jnp.abs(fill - xf[N - 1])
    else:
        spurious_end = jnp.float32(0.0)
    smooth_extra = across - junction - spurious_end

    parameters_penalty = 0.1 * (float(num_params) / 412049.0 - 1.0)
    scalars = jnp.stack([
        jnp.float32(attention_max), jnp.float32(lambda_l2_reg),
        jnp.float32(alpha_smooth_reg), jnp.float32(parameters_penalty),
        smooth_extra.astype(jnp.float32),
        jnp.float32(0.0), jnp.float32(0.0), jnp.float32(0.0)])

    kernel = _make_loss_kernel(TR, C, T)

    grid_spec = pltpu.PrefetchScalarGridSpec(
        num_scalar_prefetch=0,
        grid=(T,),
        in_specs=[
            pl.BlockSpec(memory_space=pltpu.MemorySpace.SMEM),          # hyperparams
            pl.BlockSpec((TR, C), lambda i: (i, 0)),                    # input
            pl.BlockSpec((TR, C), lambda i: (i, 0)),                    # target
            pl.BlockSpec((params_2d.shape[0], 128), lambda i: (0, 0)),  # params (resident)
        ],
        out_specs=pl.BlockSpec(memory_space=pltpu.MemorySpace.SMEM),
        scratch_shapes=[
            pltpu.VMEM((8, C), jnp.float32),    # L1 sum
            pltpu.VMEM((8, C), jnp.float32),    # smoothness sum
            pltpu.VMEM((8, C), jnp.float32),    # max(input)
            pltpu.VMEM((8, C), jnp.float32),    # max(target)
        ],
    )

    total = pl.pallas_call(
        kernel,
        out_shape=jax.ShapeDtypeStruct((1,), jnp.float32),
        grid_spec=grid_spec,
        compiler_params=pltpu.CompilerParams(
            dimension_semantics=("arbitrary",),     # carried reduction axis
            vmem_limit_bytes=int(vmem_limit),
        ),
    )(scalars, x2d, y2d, params_2d)
    return total[0]


# ----------------------------------------------------------------------------
# Reference + self-test
# ----------------------------------------------------------------------------
def _reference_loss(inp, tgt, model_params, attention_max, lambda_l2_reg,
                    alpha_smooth_reg):
    l1 = jnp.sum(jnp.abs(inp - tgt))
    smooth = alpha_smooth_reg * jnp.sum(jnp.abs(inp[:, 1:] - inp[:, :-1]))
    peak = attention_max * jnp.abs(jnp.max(inp) - jnp.max(tgt))
    l2 = lambda_l2_reg * sum(jnp.sum(p ** 2) for p in model_params)
    n_params = sum(int(p.size) for p in model_params)
    pen = 0.1 * (n_params / 412049.0 - 1.0)
    return l1 + l2 + smooth + peak + pen


if __name__ == "__main__":
    key = jax.random.PRNGKey(0)
    k_in, k_tgt, k_w1, k_b1, k_w2, k_b2, k_in2, k_tgt2 = jax.random.split(key, 8)

    # deterministic synthetic "model" parameters (the loss only consumes
    # sum(p^2) and the total parameter count)
    model_params = [
        jax.random.normal(k_w1, (4, 1, 3, 3), dtype=jnp.float32) * 0.1,  # conv weight
        jax.random.normal(k_b1, (4,), dtype=jnp.float32) * 0.1,          # conv bias
        jax.random.normal(k_w2, (8, 32), dtype=jnp.float32) * 0.1,       # linear weight
        jax.random.normal(k_b2, (8,), dtype=jnp.float32) * 0.1,          # linear bias
    ]
    params_2d, num_params = prepare_params(model_params)   # hoisted, done once

    # ---- small case (matches the module's typical tiny shapes) ----
    B, L = 2, 16
    inp = jax.random.normal(k_in, (B, L), dtype=jnp.float32)
    tgt = jax.random.normal(k_tgt, (B, L), dtype=jnp.float32)

    total = my_custom_loss(inp, tgt, params_2d, num_params,
                           attention_max=1.0, lambda_l2_reg=0.01,
                           alpha_smooth_reg=0.1)
    total = jax.block_until_ready(total)
    total_ref = _reference_loss(inp, tgt, model_params, 1.0, 0.01, 0.1)
    assert jnp.allclose(total, total_ref, rtol=1e-4, atol=1e-4), (total, total_ref)

    # ---- odd-shaped multi-block case (exercises accumulation + boundary terms) ----
    B2, L2 = 3, 2000
    inp2 = jax.random.normal(k_in2, (B2, L2), dtype=jnp.float32)
    tgt2 = jax.random.normal(k_tgt2, (B2, L2), dtype=jnp.float32)
    total2 = my_custom_loss(inp2, tgt2, params_2d, num_params,
                            attention_max=1.0, lambda_l2_reg=0.01,
                            alpha_smooth_reg=0.1,
                            lane_width=256, max_block_rows=8)
    total2 = jax.block_until_ready(total2)
    total2_ref = _reference_loss(inp2, tgt2, model_params, 1.0, 0.01, 0.1)
    assert jnp.allclose(total2, total2_ref, rtol=2e-4, atol=2e-4), (total2, total2_ref)

    print("KERNEL_OK")
</pallas_src>

<mosaic_0001>
module attributes {stable_mosaic.version = 11 : i64} {
  func.func @kernel(%arg0: i32, %arg1: memref<8xf32, #tpu.memory_space<smem>>, %arg2: memref<8x512xf32, #tpu.memory_space<vmem>>, %arg3: memref<8x512xf32, #tpu.memory_space<vmem>>, %arg4: memref<8x128xf32, #tpu.memory_space<vmem>>, %arg5: memref<1xf32, #tpu.memory_space<smem>>, %arg6: memref<8x512xf32, #tpu.memory_space<vmem>>, %arg7: memref<8x512xf32, #tpu.memory_space<vmem>>, %arg8: memref<8x512xf32, #tpu.memory_space<vmem>>, %arg9: memref<8x512xf32, #tpu.memory_space<vmem>>) attributes {dimension_semantics = [#tpu.dimension_semantics<arbitrary>], iteration_bounds = array<i64: 1>, scalar_prefetch = 0 : i64, scratch_operands = 4 : i64, tpu.core_type = #tpu.core_type<tc>, window_params = [{transform_indices = @transform_0, window_bounds = array<i64: 8>}, {transform_indices = @transform_1, window_bounds = array<i64: 8, 512>}, {transform_indices = @transform_2, window_bounds = array<i64: 8, 512>}, {pipeline_mode = #tpu.pipeline_mode<synchronous>, transform_indices = @transform_3, window_bounds = array<i64: 8, 128>}, {transform_indices = @transform_4, window_bounds = array<i64: 1>}]} {
    %c0 = arith.constant 0 : index
    %c0_0 = arith.constant 0 : index
    %0 = vector.load %arg2[%c0, %c0_0] : memref<8x512xf32, #tpu.memory_space<vmem>>, vector<8x512xf32>
    %c0_1 = arith.constant 0 : index
    %c0_2 = arith.constant 0 : index
    %1 = vector.load %arg3[%c0_1, %c0_2] : memref<8x512xf32, #tpu.memory_space<vmem>>, vector<8x512xf32>
    %2 = arith.subf %0, %1 : vector<8x512xf32>
    %3 = math.absf %2 : vector<8x512xf32>
    %4 = vector.extract_strided_slice %0 {offsets = [0, 0], sizes = [8, 1], strides = [1, 1]} : vector<8x512xf32> to vector<8x1xf32>
    %5 = vector.extract_strided_slice %0 {offsets = [0, 0], sizes = [8, 511], strides = [1, 1]} : vector<8x512xf32> to vector<8x511xf32>
    %6 = tpu.concatenate %4, %5 in 1 : vector<8x1xf32>, vector<8x511xf32> -> vector<8x512xf32>
    %7 = arith.subf %0, %6 : vector<8x512xf32>
    %8 = math.absf %7 : vector<8x512xf32>
    %c0_i32 = arith.constant 0 : i32
    %9 = arith.cmpi eq, %arg0, %c0_i32 : i32
    %10 = arith.extui %9 : i1 to i32
    %c0_i32_3 = arith.constant 0 : i32
    %11 = arith.cmpi ne, %10, %c0_i32_3 : i32
    scf.if %11 {
      %c0_8 = arith.constant 0 : index
      %c0_9 = arith.constant 0 : index
      %18 = vector.load %arg6[%c0_8, %c0_9] : memref<8x512xf32, #tpu.memory_space<vmem>>, vector<8x512xf32>
      tpu.vector_store %arg6[%c0_8, %c0_9], %3 {strides = array<i32>} : memref<8x512xf32, #tpu.memory_space<vmem>>, vector<8x512xf32>,
      %c0_10 = arith.constant 0 : index
      %c0_11 = arith.constant 0 : index
      %19 = vector.load %arg7[%c0_10, %c0_11] : memref<8x512xf32, #tpu.memory_space<vmem>>, vector<8x512xf32>
      tpu.vector_store %arg7[%c0_10, %c0_11], %8 {strides = array<i32>} : memref<8x512xf32, #tpu.memory_space<vmem>>, vector<8x512xf32>,
      %c0_12 = arith.constant 0 : index
      %c0_13 = arith.constant 0 : index
      %20 = vector.load %arg8[%c0_12, %c0_13] : memref<8x512xf32, #tpu.memory_space<vmem>>, vector<8x512xf32>
      tpu.vector_store %arg8[%c0_12, %c0_13], %0 {strides = array<i32>} : memref<8x512xf32, #tpu.memory_space<vmem>>, vector<8x512xf32>,
      %c0_14 = arith.constant 0 : index
      %c0_15 = arith.constant 0 : index
      %21 = vector.load %arg9[%c0_14, %c0_15] : memref<8x512xf32, #tpu.memory_space<vmem>>, vector<8x512xf32>
      tpu.vector_store %arg9[%c0_14, %c0_15], %1 {strides = array<i32>} : memref<8x512xf32, #tpu.memory_space<vmem>>, vector<8x512xf32>,
    } else {
    }
    %c0_i32_4 = arith.constant 0 : i32
    %12 = arith.cmpi sgt, %arg0, %c0_i32_4 : i32
    %13 = arith.extui %12 : i1 to i32
    %c0_i32_5 = arith.constant 0 : i32
    %14 = arith.cmpi ne, %13, %c0_i32_5 : i32
    scf.if %14 {
      %c0_8 = arith.constant 0 : index
      %c0_9 = arith.constant 0 : index
      %18 = vector.load %arg6[%c0_8, %c0_9] : memref<8x512xf32, #tpu.memory_space<vmem>>, vector<8x512xf32>
      %19 = arith.addf %18, %3 : vector<8x512xf32>
      %c0_10 = arith.constant 0 : index
      %c0_11 = arith.constant 0 : index
      %20 = vector.load %arg6[%c0_10, %c0_11] : memref<8x512xf32, #tpu.memory_space<vmem>>, vector<8x512xf32>
      tpu.vector_store %arg6[%c0_10, %c0_11], %19 {strides = array<i32>} : memref<8x512xf32, #tpu.memory_space<vmem>>, vector<8x512xf32>,
      %c0_12 = arith.constant 0 : index
      %c0_13 = arith.constant 0 : index
      %21 = vector.load %arg7[%c0_12, %c0_13] : memref<8x512xf32, #tpu.memory_space<vmem>>, vector<8x512xf32>
      %22 = arith.addf %21, %8 : vector<8x512xf32>
      %c0_14 = arith.constant 0 : index
      %c0_15 = arith.constant 0 : index
      %23 = vector.load %arg7[%c0_14, %c0_15] : memref<8x512xf32, #tpu.memory_space<vmem>>, vector<8x512xf32>
      tpu.vector_store %arg7[%c0_14, %c0_15], %22 {strides = array<i32>} : memref<8x512xf32, #tpu.memory_space<vmem>>, vector<8x512xf32>,
      %c0_16 = arith.constant 0 : index
      %c0_17 = arith.constant 0 : index
      %24 = vector.load %arg8[%c0_16, %c0_17] : memref<8x512xf32, #tpu.memory_space<vmem>>, vector<8x512xf32>
      %25 = arith.maximumf %24, %0 : vector<8x512xf32>
      %c0_18 = arith.constant 0 : index
      %c0_19 = arith.constant 0 : index
      %26 = vector.load %arg8[%c0_18, %c0_19] : memref<8x512xf32, #tpu.memory_space<vmem>>, vector<8x512xf32>
      tpu.vector_store %arg8[%c0_18, %c0_19], %25 {strides = array<i32>} : memref<8x512xf32, #tpu.memory_space<vmem>>, vector<8x512xf32>,
      %c0_20 = arith.constant 0 : index
      %c0_21 = arith.constant 0 : index
      %27 = vector.load %arg9[%c0_20, %c0_21] : memref<8x512xf32, #tpu.memory_space<vmem>>, vector<8x512xf32>
      %28 = arith.maximumf %27, %1 : vector<8x512xf32>
      %c0_22 = arith.constant 0 : index
      %c0_23 = arith.constant 0 : index
      %29 = vector.load %arg9[%c0_22, %c0_23] : memref<8x512xf32, #tpu.memory_space<vmem>>, vector<8x512xf32>
      tpu.vector_store %arg9[%c0_22, %c0_23], %28 {strides = array<i32>} : memref<8x512xf32, #tpu.memory_space<vmem>>, vector<8x512xf32>,
    } else {
    }
    %c0_i32_6 = arith.constant 0 : i32
    %15 = arith.cmpi eq, %arg0, %c0_i32_6 : i32
    %16 = arith.extui %15 : i1 to i32
    %c0_i32_7 = arith.constant 0 : i32
    %17 = arith.cmpi ne, %16, %c0_i32_7 : i32
    scf.if %17 {
      %c0_8 = arith.constant 0 : index
      %18 = memref.load %arg1[%c0_8] : memref<8xf32, #tpu.memory_space<smem>>
      %c1 = arith.constant 1 : index
      %19 = memref.load %arg1[%c1] : memref<8xf32, #tpu.memory_space<smem>>
      %c2 = arith.constant 2 : index
      %20 = memref.load %arg1[%c2] : memref<8xf32, #tpu.memory_space<smem>>
      %c3 = arith.constant 3 : index
      %21 = memref.load %arg1[%c3] : memref<8xf32, #tpu.memory_space<smem>>
      %c4 = arith.constant 4 : index
      %22 = memref.load %arg1[%c4] : memref<8xf32, #tpu.memory_space<smem>>
      %c0_9 = arith.constant 0 : index
      %c0_10 = arith.constant 0 : index
      %23 = vector.load %arg6[%c0_9, %c0_10] : memref<8x512xf32, #tpu.memory_space<vmem>>, vector<8x512xf32>
      %24 = vector.shape_cast %23 : vector<8x512xf32> to vector<1x8x512xf32>
      %cst = arith.constant dense<0.000000e+00> : vector<1xf32>
      %25 = vector.multi_reduction <add>, %24, %cst [1, 2] : vector<1x8x512xf32> to vector<1xf32>
      %26 = vector.shape_cast %25 : vector<1xf32> to vector<1x1x1xf32>
      %27 = vector.extract %26[0, 0, 0] : f32 from vector<1x1x1xf32>
      %c0_11 = arith.constant 0 : index
      %c0_12 = arith.constant 0 : index
      %28 = vector.load %arg7[%c0_11, %c0_12] : memref<8x512xf32, #tpu.memory_space<vmem>>, vector<8x512xf32>
      %29 = vector.shape_cast %28 : vector<8x512xf32> to vector<1x8x512xf32>
      %cst_13 = arith.constant dense<0.000000e+00> : vector<1xf32>
      %30 = vector.multi_reduction <add>, %29, %cst_13 [1, 2] : vector<1x8x512xf32> to vector<1xf32>
      %31 = vector.shape_cast %30 : vector<1xf32> to vector<1x1x1xf32>
      %32 = vector.extract %31[0, 0, 0] : f32 from vector<1x1x1xf32>
      %33 = arith.addf %32, %22 : f32
      %c0_14 = arith.constant 0 : index
      %c0_15 = arith.constant 0 : index
      %34 = vector.load %arg8[%c0_14, %c0_15] : memref<8x512xf32, #tpu.memory_space<vmem>>, vector<8x512xf32>
      %35 = vector.shape_cast %34 : vector<8x512xf32> to vector<1x8x512xf32>
      %cst_16 = arith.constant dense<0xFF800000> : vector<1xf32>
      %36 = vector.multi_reduction <maximumf>, %35, %cst_16 [1, 2] : vector<1x8x512xf32> to vector<1xf32>
      %37 = vector.shape_cast %36 : vector<1xf32> to vector<1x1x1xf32>
      %38 = vector.extract %37[0, 0, 0] : f32 from vector<1x1x1xf32>
      %c0_17 = arith.constant 0 : index
      %c0_18 = arith.constant 0 : index
      %39 = vector.load %arg9[%c0_17, %c0_18] : memref<8x512xf32, #tpu.memory_space<vmem>>, vector<8x512xf32>
      %40 = vector.shape_cast %39 : vector<8x512xf32> to vector<1x8x512xf32>
      %cst_19 = arith.constant dense<0xFF800000> : vector<1xf32>
      %41 = vector.multi_reduction <maximumf>, %40, %cst_19 [1, 2] : vector<1x8x512xf32> to vector<1xf32>
      %42 = vector.shape_cast %41 : vector<1xf32> to vector<1x1x1xf32>
      %43 = vector.extract %42[0, 0, 0] : f32 from vector<1x1x1xf32>
      %c0_20 = arith.constant 0 : index
      %c0_21 = arith.constant 0 : index
      %44 = vector.load %arg4[%c0_20, %c0_21] : memref<8x128xf32, #tpu.memory_space<vmem>>, vector<8x128xf32>
      %45 = arith.mulf %44, %44 : vector<8x128xf32>
      %46 = vector.shape_cast %45 : vector<8x128xf32> to vector<1x8x128xf32>
      %cst_22 = arith.constant dense<0.000000e+00> : vector<1xf32>
      %47 = vector.multi_reduction <add>, %46, %cst_22 [1, 2] : vector<1x8x128xf32> to vector<1xf32>
      %48 = vector.shape_cast %47 : vector<1xf32> to vector<1x1x1xf32>
      %49 = vector.extract %48[0, 0, 0] : f32 from vector<1x1x1xf32>
      %50 = arith.mulf %19, %49 : f32
      %51 = arith.addf %27, %50 : f32
      %52 = arith.mulf %20, %33 : f32
      %53 = arith.addf %51, %52 : f32
      %54 = arith.subf %38, %43 : f32
      %55 = math.absf %54 : f32
      %56 = arith.mulf %18, %55 : f32
      %57 = arith.addf %53, %56 : f32
      %58 = arith.addf %57, %21 : f32
      %c0_23 = arith.constant 0 : index
      %59 = memref.load %arg5[%c0_23] : memref<1xf32, #tpu.memory_space<smem>>
      memref.store %58, %arg5[%c0_23] : memref<1xf32, #tpu.memory_space<smem>>
    } else {
    }
    return
  }
  func.func @transform_0(%arg0: i32) -> i32 {
    %c0_i32 = arith.constant 0 : i32
    %c0_i32_0 = arith.constant 0 : i32
    return %c0_i32 : i32
  }
  func.func @transform_1(%arg0: i32) -> (i32, i32) {
    %c0_i32 = arith.constant 0 : i32
    %c0_i32_0 = arith.constant 0 : i32
    return %arg0, %c0_i32 : i32, i32
  }
  func.func @transform_2(%arg0: i32) -> (i32, i32) {
    %c0_i32 = arith.constant 0 : i32
    %c0_i32_0 = arith.constant 0 : i32
    return %arg0, %c0_i32 : i32, i32
  }
  func.func @transform_3(%arg0: i32) -> (i32, i32) {
    %c0_i32 = arith.constant 0 : i32
    %c0_i32_0 = arith.constant 0 : i32
    %c0_i32_1 = arith.constant 0 : i32
    return %c0_i32, %c0_i32_0 : i32, i32
  }
  func.func @transform_4(%arg0: i32) -> i32 {
    %c0_i32 = arith.constant 0 : i32
    %c0_i32_0 = arith.constant 0 : i32
    return %c0_i32 : i32
  }
}

</mosaic_0001>

<bundles_post_ra>
// kernel: tpu_custom_call.1
= control target key start
LH: loop header
LB: loop body
LE: loop exit
PB: predicated region body
PF: predicated region fallthrough
CT: control target
= control target key end

     0   :  { %9 = vsyncpa [#allocation8], 0  ;;  %s472_s0 = inlined_call_operand.hbm [shape: f32[8], index: 0, kind: input, shape index: {}]   ;;  %s473_s1 = inlined_call_operand.hbm [shape: f32[8,512], index: 1, kind: input, shape index: {}]   ;;  %s474_s2 = inlined_call_operand.hbm [shape: f32[8,512], index: 2, kind: input, shape index: {}]   ;;  %s475_s3 = inlined_call_operand.hbm [shape: f32[8,128], index: 3, kind: input, shape index: {}]   ;;  %s476_s4 = inlined_call_operand.hbm [shape: f32[1], index: 4, kind: output, shape index: {}]  }
   0x1   :  { %10 = vsyncpa [#allocation7], 0 }
   0x2   :  { %11 = vsyncpa [#allocation12], 0  ;;  %s38_s17 = sshll.u32 %s474_s2, 4  ;;  %s39_s17 = int_to_ptr.hbm [resolvable:$true] %s38_s17 }
   0x3   :  { %12 = vsyncpa [#allocation9], 0  ;;  %s426_s18 = smov [#allocation11]   ;;  %s18_s22 = sshll.u32 %s472_s0, 4  ;;  %s19_s22 = int_to_ptr.hbm [resolvable:$true] %s18_s22 }
   0x4   :  { %s40_s19 = sshll.u32 %s426_s18, 4  ;;  %s427_s23 = smov [#allocation6]   ;;  %s41_s19 = int_to_ptr.vmem [resolvable:$true] %s40_s19 }
   0x5   :  { %43 = dma.hbm_to_vmem [thread:$0]  %s39_s17, 512, %s41_s19, [#allocation12]  }
   0x6   :  { %21 = dma.hbm_to_smem %s19_s22, 16, %s427_s23, [#allocation8]  }
   0x7   :  { %s27_s26 = sshll.u32 %s473_s1, 4  ;;  %s428_s27 = smov [#allocation10]   ;;  %s28_s26 = int_to_ptr.hbm [resolvable:$true] %s27_s26 }
   0x8   :  { %s29_s2 = sshll.u32 %s428_s27, 4  ;;  %s49_s30 = sshll.u32 %s475_s3, 4  ;;  %s30_s2 = int_to_ptr.vmem [resolvable:$true] %s29_s2  ;;  %s50_s30 = int_to_ptr.hbm [resolvable:$true] %s49_s30 }
   0x9   :  { %32 = dma.hbm_to_vmem [thread:$0]  %s28_s26, 512, %s30_s2, [#allocation7]  }
   0xa   :  { %s429_s5 = smov [#allocation13]  }
   0xb   :  { %s51_s0 = sshll.u32 %s429_s5, 4  ;;  %s52_s0 = int_to_ptr.vmem [resolvable:$true] %s51_s0 }
   0xc   :  { %54 = dma.hbm_to_vmem [thread:$0]  %s50_s30, 128, %s52_s0, [#allocation12]  }
   0xd   :  { %418 = dma.done.wait [#allocation8], 16  }
   0xe   :  { %419 = vsyncadd [#allocation8], 4294967280 }
   0xf   :  { %420 = dma.done.wait [#allocation7], 512  }
  0x10   :  { %421 = vsyncadd [#allocation7], 4294966784 }
  0x11   :  { %422 = dma.done.wait [#allocation12], 640  }
  0x12   :  { %423 = vsyncadd [#allocation12], 4294966656 }
  0x13   :  { %71 = sfence }
  0x14   :  { %v74_v0 = vld [vmem:[#allocation10 + $0x10] sm:$0xff]  ;;  %v72_v1 = vld [vmem:[#allocation10] sm:$0xff]  ;;  %s430_s1 = smov 1   ;;  %v75_v2 = vld [vmem:[#allocation10 + $0x18] sm:$0xff]  ;;  %vm100_vm0 = vcmask 7168   ;;  %s305_s6 = sld [smem:[#allocation6 + $0x4]] }
  0x15   :  { %96 = vrot.lane.b32.xlu1 %v74_v0, %s430_s1  ;;  %92 = vrot.lane.b32.xlu0 %v72_v1, %s430_s1  ;;  %v73_v3 = vld [vmem:[#allocation10 + $0x8] sm:$0xff]  ;;  %v76_v4 = vld [vmem:[#allocation11] sm:$0xff]  ;;  %v78_v8 = vld [vmem:[#allocation11 + $0x10] sm:$0xff]  ;;  %v235_v22 = vmax.f32 %v74_v0, %v75_v2  ;;  %s302_s9 = sld [smem:[#allocation6 + $0x1]]  ;;  %s289_s23 = sshll.u32 %s476_s4, 4  ;;  %s290_s23 = int_to_ptr.hbm [resolvable:$true] %s289_s23 }
  0x16   :  { %v77_v5 = vld [vmem:[#allocation11 + $0x8] sm:$0xff]  ;;  %v80_v6 = vsub.f32 %v72_v1, %v76_v4  ;;  %v82_v9 = vsub.f32 %v74_v0, %v78_v8  ;;  %v79_v12 = vld [vmem:[#allocation11 + $0x18] sm:$0xff]  ;;  %v234_v21 = vmax.f32 %v72_v1, %v73_v3  ;;  %v262_v44 = vld [vmem:[#allocation13] sm:$0xff]  ;;  %s303_s10 = sld [smem:[#allocation6 + $0x2]]  ;;  %s431_s2 = smov [#allocation14]  }
  0x17   :  { %v81_v7 = vsub.f32 %v73_v3, %v77_v5  ;;  %v83_v13 = vsub.f32 %v75_v2, %v79_v12  ;;  %v250_v19 = vmax.f32 %v76_v4, %v77_v5  ;;  %v251_v20 = vmax.f32 %v78_v8, %v79_v12  ;;  %s192_s12 = sld [smem:[#allocation6]] }
  0x18   :  { %v84_v10 = vand.u32 2147483647, %v80_v6  ;;  %v86_v14 = vand.u32 2147483647, %v82_v9  ;;  %v236_v24 = vmax.f32 %v234_v21, %v235_v22  ;;  %v263_v45 = vmul.f32 %v262_v44, %v262_v44  ;;  %s304_s17 = sld [smem:[#allocation6 + $0x3]] }
  0x19   :  { %v85_v11 = vand.u32 2147483647, %v81_v7  ;;  %v87_v16 = vand.u32 2147483647, %v83_v13  ;;  %v252_v23 = vmax.f32 %v250_v19, %v251_v20 }
  0x1b   :  { %v201_v15 = vadd.f32 %v85_v11, %v84_v10 }
  0x1d   :  { %98 = vrot.lane.b32.xlu1 %v75_v2, %s430_s1  ;;  %94 = vrot.lane.b32.xlu0 %v73_v3, %s430_s1  ;;  %v202_v17 = vadd.f32 %v201_v15, %v86_v14 }
  0x1f   :  { %v203_v18 = vadd.f32 %v202_v17, %v87_v16 }
  0x21   :  { %204 = vadd.xlane.f32.xlu2 %v203_v18 }
  0x47   :  { %253 = vmax.xlane.f32.xlu1 %v252_v23  ;;  %237 = vmax.xlane.f32.xlu0 %v236_v24 }
  0x87   :  { %v97_v25 = vpop.permute.xlu1 %96  ;;  %v93_v26 = vpop.permute.xlu0 %92 }
  0x88   :  { %v108_v27 = vsel %vm100_vm0, %v72_v1, %v93_v26 }
  0x89   :  { %v109_v28 = vsub.f32 %v72_v1, %v108_v27 }
  0x8b   :  { %v113_v36 = vand.u32 2147483647, %v109_v28 }
  0x8f   :  { %v99_v29 = vpop.permute.xlu1 %98  ;;  %v95_v30 = vpop.permute.xlu0 %94 }
  0x90   :  { %v103_v31 = vsel %vm100_vm0, %v97_v25, %v99_v29  ;;  %v101_v32 = vsel %vm100_vm0, %v93_v26, %v95_v30  ;;  %v102_v33 = vsel %vm100_vm0, %v95_v30, %v97_v25 }
  0x91   :  { %v110_v34 = vsub.f32 %v73_v3, %v101_v32  ;;  %v111_v35 = vsub.f32 %v74_v0, %v102_v33  ;;  %v112_v37 = vsub.f32 %v75_v2, %v103_v31 }
  0x93   :  { %v114_v38 = vand.u32 2147483647, %v110_v34  ;;  %v115_v39 = vand.u32 2147483647, %v111_v35  ;;  %v116_v41 = vand.u32 2147483647, %v112_v37 }
  0x94   :  { %v205_v46 = vpop.xlane.xlu2 %204 }
  0x95   :  { %v217_v40 = vadd.f32 %v114_v38, %v113_v36  ;;  %v206_v47 = vrot.slane %v205_v46, 4 }
  0x97   :  { %v218_v42 = vadd.f32 %v217_v40, %v115_v39  ;;  %v207_v48 = vadd.f32 %v206_v47, %v205_v46 }
  0x99   :  { %v219_v43 = vadd.f32 %v218_v42, %v116_v41  ;;  %v208_v49 = vrot.slane %v207_v48, 2 }
  0x9b   :  { %220 = vadd.xlane.f32.xlu2 %v219_v43  ;;  %v209_v50 = vadd.f32 %v208_v49, %v207_v48 }
  0x9d   :  { %v210_v51 = vrot.slane %v209_v50, 1 }
  0x9f   :  { %v211_v52 = vadd.f32 %v210_v51, %v209_v50 }
  0xa1   :  { %306 = vpush %v211_v52 }
  0xa3   :  { %264 = vadd.xlane.f32.xlu2 %v263_v45 }
  0xba   :  { %v238_v53 = vpop.xlane.xlu0 %237  ;;  %v254_v54 = vpop.xlane.xlu1 %253 }
  0xbb   :  { %v239_v55 = vrot.slane %v238_v53, 4  ;;  %v255_v56 = vrot.slane %v254_v54, 4 }
  0xbd   :  { %v240_v57 = vmax.f32 %v238_v53, %v239_v55  ;;  %v256_v58 = vmax.f32 %v254_v54, %v255_v56 }
  0xbf   :  { %v241_v59 = vrot.slane %v240_v57, 2  ;;  %v257_v60 = vrot.slane %v256_v58, 2 }
  0xc1   :  { %v242_v63 = vmax.f32 %v240_v57, %v241_v59  ;;  %v258_v1 = vmax.f32 %v256_v58, %v257_v60 }
  0xc3   :  { %v243_v3 = vrot.slane %v242_v63, 1  ;;  %v259_v5 = vrot.slane %v258_v1, 1 }
  0xc5   :  { %v244_v9 = vmax.f32 %v242_v63, %v243_v3  ;;  %v260_v12 = vmax.f32 %v258_v1, %v259_v5 }
  0xd2   :  { %s307_s3 = spop %306 }
 0x10e   :  { %v221_v61 = vpop.xlane.xlu2 %220 }
 0x10f   :  { %v222_v62 = vrot.slane %v221_v61, 4 }
 0x111   :  { %v223_v0 = vadd.f32 %v222_v62, %v221_v61 }
 0x113   :  { %v224_v2 = vrot.slane %v223_v0, 2 }
 0x115   :  { %v225_v4 = vadd.f32 %v224_v2, %v223_v0 }
 0x116   :  { %v265_v6 = vpop.xlane.xlu2 %264 }
 0x117   :  { %v266_v7 = vrot.slane %v265_v6, 4  ;;  %v226_v8 = vrot.slane %v225_v4, 1 }
 0x119   :  { %v267_v10 = vadd.f32 %v266_v7, %v265_v6  ;;  %v227_v11 = vadd.f32 %v226_v8, %v225_v4 }
 0x11b   :  { %v268_v13 = vrot.slane %v267_v10, 2  ;;  %308 = vpush %v227_v11 }
 0x11c   :  { %310 = vpush %v244_v9 }
 0x11d   :  { %v269_v14 = vadd.f32 %v268_v13, %v267_v10  ;;  %312 = vpush %v260_v12 }
 0x11f   :  { %v270_v15 = vrot.slane %v269_v14, 1 }
 0x121   :  { %v271_v16 = vadd.f32 %v270_v15, %v269_v14 }
 0x123   :  { %314 = vpush %v271_v16 }
 0x14c   :  { %s309_s7 = spop %308 }
 0x14d   :  { %s311_s8 = spop %310  ;;  %s229_s14 = sadd.f32 %s309_s7, %s305_s6 }
 0x14e   :  { %s313_s11 = spop %312 }
 0x14f   :  { %s277_s13 = ssub.f32 %s311_s8, %s313_s11  ;;  %s275_s19 = smul.f32 %s303_s10, %s229_s14 }
 0x151   :  { %s278_s18 = sand.u32 2147483647, %s277_s13 }
 0x152   :  { %s279_s24 = smul.f32 %s278_s18, %s192_s12 }
 0x154   :  { %s315_s15 = spop %314 }
 0x155   :  { %s273_s16 = smul.f32 %s315_s15, %s302_s9 }
 0x157   :  { %s274_s20 = sadd.f32 %s307_s3, %s273_s16 }
 0x159   :  { %s276_s25 = sadd.f32 %s275_s19, %s274_s20 }
 0x15b   :  { %s280_s26 = sadd.f32 %s279_s24, %s276_s25 }
 0x15d   :  { %s281_s27 = sadd.f32 %s304_s17, %s280_s26 }
 0x15f   :  { %283 = sst [smem:[#allocation14]] %s281_s27 }
 0x160   :  { %292 = dma.smem_to_hbm %s431_s2, 16, %s290_s23, [#allocation9]  }
 0x161   :  { %424 = dma.done.wait [#allocation9], 16  }
 0x162   :  { %425 = vsyncadd [#allocation9], 4294967280 }
 0x163   :  { %297 = sfence }
 0x164   :  { %298 = vsyncpa [#allocation7], 1 }
 0x165   :  { %299 = vsyncpa [#allocation12], 1 }
 0x166   :  { %300 = vsyncpa [#allocation8], 1 }
 0x167   :  { %301 = vsyncpa [#allocation9], 1 }

</bundles_post_ra>
